<compile_context>
chip_gen: v5e
topology: v5e:2x2
jax: 0.10.0
libtpu: 0.0.40
codegen_flags: <defaults>
</compile_context>

<pallas_src>
import functools

import jax
import jax.numpy as jnp
from jax.experimental import pallas as pl
from jax.experimental.pallas import tpu as pltpu

EPS = 1e-09
COLS = 128          # lane width; full-width row blocks are contiguous in HBM
SUBLANE = 8


def _tpu_limits():
    """Generation-aware VMEM budget -> (vmem_limit_bytes, max_block_rows)."""
    try:
        cap = int(pltpu.get_tpu_info().vmem_capacity_bytes)
    except Exception:
        cap = 64 * 1024 * 1024                       # conservative (v7x-sized)
    vmem_limit = min(3 * cap // 4, 64 * 1024 * 1024)
    # Block size accounted in f32 terms (kernel upcasts in-vreg).  'none' path
    # working set ~ (2 in + 1 out) x 2 buffers x block + f32 temporaries.
    block_bytes = min(4 * 1024 * 1024, vmem_limit // 12)
    max_block_rows = max(SUBLANE, (block_bytes // (COLS * 4)) // SUBLANE * SUBLANE)
    return vmem_limit, max_block_rows


def _plan(total, max_block_rows):
    rows = -(-total // COLS)                         # ceil(total / 128)
    rows = -(-rows // SUBLANE) * SUBLANE             # sublane multiple
    block_rows = rows if rows <= max_block_rows else max_block_rows
    num_blocks = -(-rows // block_rows)              # last block may be partial
    return rows, block_rows, num_blocks


def _to_slab(x, rows):
    """Flatten to a lane-dense (rows, 128) slab in the NATIVE dtype.
    Zero-pads only for ragged element counts (aligned: metadata-only reshape)."""
    flat = x.reshape(-1)
    padded = rows * COLS
    if padded != flat.shape[0]:
        flat = jnp.pad(flat, (0, padded - flat.shape[0]))
    return flat.reshape(rows, COLS)


# ---------------- elementwise kernel (reduction='none') ----------------
def _rmse_elem_kernel(p_ref, t_ref, o_ref, *, eps):
    d = p_ref[...].astype(jnp.float32) - t_ref[...].astype(jnp.float32)
    o_ref[...] = jnp.sqrt(d * d + eps).astype(o_ref.dtype)


# ------------- per-block partial-sum kernel ('sum' / 'mean') -----------
def _rmse_partial_kernel(p_ref, t_ref, o_ref, *, eps, total, masked):
    block_rows, cols = p_ref.shape
    d = p_ref[...].astype(jnp.float32) - t_ref[...].astype(jnp.float32)
    v = jnp.sqrt(d * d + eps)
    if masked:
        # Static mask of padded / out-of-bounds elements (flat index >= total).
        # TODO(synk): int32 flat index limits this path to < 2**31 elements.
        i = pl.program_id(0)
        row = jax.lax.broadcasted_iota(jnp.int32, (block_rows, cols), 0)
        lane = jax.lax.broadcasted_iota(jnp.int32, (block_rows, cols), 1)
        flat_idx = (row + i * block_rows) * cols + lane
        v = jnp.where(flat_idx < total, v, 0.0)
    # Per-block, per-lane partial sum: VPU adds across vregs + one cheap
    # intra-vreg sublane reduce, all hidden under the HBM-bound DMA.
    o_ref[...] = jnp.sum(v, axis=0, keepdims=True)[None]


def rmse_loss(y_pred, y_true, reduction="mean", eps=EPS):
    """Pallas implementation of RMSELoss.forward."""
    assert y_pred.shape == y_true.shape
    orig_shape = y_pred.shape
    total = int(y_pred.size)
    out_dtype = jnp.promote_types(y_pred.dtype, y_true.dtype)
    if not jnp.issubdtype(out_dtype, jnp.floating):
        out_dtype = jnp.float32

    vmem_limit, max_block_rows = _tpu_limits()
    rows, block_rows, num_blocks = _plan(total, max_block_rows)
    p2 = _to_slab(y_pred, rows)
    t2 = _to_slab(y_true, rows)

    in_spec = pl.BlockSpec((block_rows, COLS), lambda i: (i, 0))
    cparams = pltpu.CompilerParams(
        dimension_semantics=("parallel",),           # megacore-shardable (v7x)
        vmem_limit_bytes=vmem_limit,
    )

    if reduction == "none":
        out2 = pl.pallas_call(
            functools.partial(_rmse_elem_kernel, eps=float(eps)),
            out_shape=jax.ShapeDtypeStruct((rows, COLS), out_dtype),
            grid_spec=pltpu.PrefetchScalarGridSpec(
                num_scalar_prefetch=0,
                grid=(num_blocks,),
                in_specs=[in_spec, in_spec],
                out_specs=in_spec,
            ),
            compiler_params=cparams,
        )(p2, t2)
        out = out2.reshape(-1)
        if rows * COLS != total:                     # ragged only
            out = out[:total]
        return out.reshape(orig_shape)

    if reduction not in ("sum", "mean"):
        raise ValueError(f"unknown reduction: {reduction}")

    masked = (num_blocks * block_rows * COLS) != total
    partials = pl.pallas_call(
        functools.partial(_rmse_partial_kernel, eps=float(eps),
                          total=total, masked=masked),
        out_shape=jax.ShapeDtypeStruct((num_blocks, 1, COLS), jnp.float32),
        grid_spec=pltpu.PrefetchScalarGridSpec(
            num_scalar_prefetch=0,
            grid=(num_blocks,),
            in_specs=[in_spec, in_spec],
            out_specs=pl.BlockSpec((1, 1, COLS), lambda i: (i, 0, 0)),
        ),
        compiler_params=cparams,
    )(p2, t2)
    result = jnp.sum(partials)                       # tiny final reduce
    if reduction == "mean":
        result = result / total
    return result.astype(out_dtype)                  # 0-dim, like torch scalar


if __name__ == "__main__":
    key = jax.random.PRNGKey(0)
    k1, k2 = jax.random.split(key)

    # NCHW input, as the PyTorch module would see
    x_shape = (2, 4, 16, 16)
    y_pred = jax.random.normal(k1, x_shape, dtype=jnp.float32)
    y_true = jax.random.normal(k2, x_shape, dtype=jnp.float32)

    loss_mean = jax.block_until_ready(rmse_loss(y_pred, y_true, "mean"))
    loss_sum = jax.block_until_ready(rmse_loss(y_pred, y_true, "sum"))
    loss_none = jax.block_until_ready(rmse_loss(y_pred, y_true, "none"))

    ref_none = jnp.sqrt((y_pred - y_true) ** 2 + EPS)
    assert loss_none.shape == x_shape and loss_mean.shape == ()
    assert jnp.allclose(loss_none, ref_none, rtol=1e-5, atol=1e-6)
    assert jnp.allclose(loss_mean, ref_none.mean(), rtol=1e-5, atol=1e-6)
    assert jnp.allclose(loss_sum, ref_none.sum(), rtol=1e-5, atol=1e-4)

    # ragged shape -> exercises padding + static in-kernel mask path
    z_shape = (2, 3, 7, 5)
    a = jax.random.normal(k1, z_shape, dtype=jnp.float32)
    b = jax.random.normal(k2, z_shape, dtype=jnp.float32)
    ref2 = jnp.sqrt((a - b) ** 2 + EPS)
    assert jnp.allclose(jax.block_until_ready(rmse_loss(a, b, "none")),
                        ref2, rtol=1e-5, atol=1e-6)
    assert jnp.allclose(jax.block_until_ready(rmse_loss(a, b, "mean")),
                        ref2.mean(), rtol=1e-5, atol=1e-5)
    assert jnp.allclose(jax.block_until_ready(rmse_loss(a, b, "sum")),
                        ref2.sum(), rtol=1e-5, atol=1e-4)

    # bf16 inputs -> exercises native-dtype streaming (no wrapper-side casts)
    pb = y_pred.astype(jnp.bfloat16)
    tb = y_true.astype(jnp.bfloat16)
    refb = jnp.sqrt((pb.astype(jnp.float32) - tb.astype(jnp.float32)) ** 2 + EPS)
    nb = jax.block_until_ready(rmse_loss(pb, tb, "none"))
    mb = jax.block_until_ready(rmse_loss(pb, tb, "mean"))
    assert nb.dtype == jnp.bfloat16 and nb.shape == x_shape
    assert jnp.allclose(nb.astype(jnp.float32), refb, rtol=1e-2, atol=1e-2)
    assert jnp.allclose(jnp.float32(mb), refb.mean(), rtol=1e-2, atol=1e-2)

    print("KERNEL_OK")
</pallas_src>

<mosaic_0001>
module attributes {stable_mosaic.version = 11 : i64} {
  func.func @_rmse_partial_kernel(%arg0: i32, %arg1: memref<16x128xf32, #tpu.memory_space<vmem>>, %arg2: memref<16x128xf32, #tpu.memory_space<vmem>>, %arg3: memref<1x1x128xf32, #tpu.memory_space<vmem>>) attributes {dimension_semantics = [#tpu.dimension_semantics<parallel>], iteration_bounds = array<i64: 1>, scalar_prefetch = 0 : i64, scratch_operands = 0 : i64, tpu.core_type = #tpu.core_type<tc>, window_params = [{transform_indices = @transform_0, window_bounds = array<i64: 16, 128>}, {transform_indices = @transform_1, window_bounds = array<i64: 16, 128>}, {transform_indices = @transform_2, window_bounds = array<i64: 1, 1, 128>}]} {
    %c0 = arith.constant 0 : index
    %c0_0 = arith.constant 0 : index
    %0 = vector.load %arg1[%c0, %c0_0] : memref<16x128xf32, #tpu.memory_space<vmem>>, vector<16x128xf32>
    %c0_1 = arith.constant 0 : index
    %c0_2 = arith.constant 0 : index
    %1 = vector.load %arg2[%c0_1, %c0_2] : memref<16x128xf32, #tpu.memory_space<vmem>>, vector<16x128xf32>
    %2 = arith.subf %0, %1 : vector<16x128xf32>
    %3 = arith.mulf %2, %2 : vector<16x128xf32>
    %cst = arith.constant 9.99999971E-10 : f32
    %4 = vector.broadcast %cst : f32 to vector<16x128xf32>
    %5 = arith.addf %3, %4 : vector<16x128xf32>
    %6 = math.sqrt %5 : vector<16x128xf32>
    %cst_3 = arith.constant dense<0.000000e+00> : vector<128xf32>
    %7 = vector.multi_reduction <add>, %6, %cst_3 [0] : vector<16x128xf32> to vector<128xf32>
    %8 = vector.shape_cast %7 : vector<128xf32> to vector<1x128xf32>
    %9 = vector.shape_cast %8 : vector<1x128xf32> to vector<1x1x128xf32>
    %c0_4 = arith.constant 0 : index
    %c0_5 = arith.constant 0 : index
    %c0_6 = arith.constant 0 : index
    %10 = vector.load %arg3[%c0_4, %c0_5, %c0_6] : memref<1x1x128xf32, #tpu.memory_space<vmem>>, vector<1x1x128xf32>
    tpu.vector_store %arg3[%c0_4, %c0_5, %c0_6], %9 {strides = array<i32>} : memref<1x1x128xf32, #tpu.memory_space<vmem>>, vector<1x1x128xf32>,
    return
  }
  func.func @transform_0(%arg0: i32) -> (i32, i32) {
    %c0_i32 = arith.constant 0 : i32
    %c0_i32_0 = arith.constant 0 : i32
    return %arg0, %c0_i32 : i32, i32
  }
  func.func @transform_1(%arg0: i32) -> (i32, i32) {
    %c0_i32 = arith.constant 0 : i32
    %c0_i32_0 = arith.constant 0 : i32
    return %arg0, %c0_i32 : i32, i32
  }
  func.func @transform_2(%arg0: i32) -> (i32, i32, i32) {
    %c0_i32 = arith.constant 0 : i32
    %c0_i32_0 = arith.constant 0 : i32
    %c0_i32_1 = arith.constant 0 : i32
    return %arg0, %c0_i32, %c0_i32_0 : i32, i32, i32
  }
}

</mosaic_0001>

<bundles_post_ra>
// kernel: tpu_custom_call.1
= control target key start
LH: loop header
LB: loop body
LE: loop exit
PB: predicated region body
PF: predicated region fallthrough
CT: control target
= control target key end

     0   :  { %7 = vsyncpa [#allocation3], 0  ;;  %s220_s0 = inlined_call_operand.hbm [shape: f32[16,128], index: 0, kind: input, shape index: {}]   ;;  %s221_s1 = inlined_call_operand.hbm [shape: f32[16,128], index: 1, kind: input, shape index: {}]   ;;  %s222_s2 = inlined_call_operand.hbm [shape: f32[1,1,128], index: 2, kind: output, shape index: {}]  }
   0x1   :  { %8 = vsyncpa [#allocation6], 0 }
   0x2   :  { %9 = vsyncpa [#allocation4], 0  ;;  %s14_s11 = sshll.u32 %s220_s0, 4  ;;  %s191_s12 = smov [#allocation2]   ;;  %s15_s11 = int_to_ptr.hbm [resolvable:$true] %s14_s11 }
   0x3   :  { %s16_s13 = sshll.u32 %s191_s12, 4  ;;  %s27_s16 = sshll.u32 %s221_s1, 4  ;;  %s17_s13 = int_to_ptr.vmem [resolvable:$true] %s16_s13  ;;  %s28_s16 = int_to_ptr.hbm [resolvable:$true] %s27_s16 }
   0x4   :  { %s192_s17 = smov 128   ;;  %s193_s18 = smov 8  }
   0x5   :  { %22 = dma.hbm_to_vmem [thread:$0]  %s15_s11, 256, %s17_s13, [#allocation3], %s192_s17, %s192_s17, %s193_s18  }
   0x6   :  { %s194_s19 = smov [#allocation5]  }
   0x7   :  { %s29_s20 = sshll.u32 %s194_s19, 4  ;;  %s30_s20 = int_to_ptr.vmem [resolvable:$true] %s29_s20 }
   0x8   :  { %35 = dma.hbm_to_vmem [thread:$0]  %s28_s16, 256, %s30_s20, [#allocation6], %s192_s17, %s192_s17, %s193_s18  }
   0x9   :  { %185 = dma.done.wait [#allocation3], 256  }
   0xa   :  { %186 = vsyncadd [#allocation3], 4294967040 }
   0xb   :  { %187 = dma.done.wait [#allocation6], 256  }
   0xc   :  { %188 = vsyncadd [#allocation6], 4294967040  ;;  %v44_v0 = vld [vmem:[#allocation2] sm:$0xff]  ;;  %v45_v1 = vld [vmem:[#allocation2 + $0x8] sm:$0xff]  ;;  %s195_s0 = smov [#allocation7]   ;;  %s93_s23 = sshll.u32 %s222_s2, 4  ;;  %s94_s23 = int_to_ptr.hbm [resolvable:$true] %s93_s23 }
   0xd   :  { %v46_v2 = vld [vmem:[#allocation5] sm:$0xff]  ;;  %v47_v3 = vld [vmem:[#allocation5 + $0x8] sm:$0xff]  ;;  %s91_s1 = sshll.u32 %s195_s0, 4  ;;  %s92_s1 = int_to_ptr.vmem [resolvable:$true] %s91_s1 }
   0xe   :  { %v48_v4 = vsub.f32 %v44_v0, %v46_v2  ;;  %v49_v5 = vsub.f32 %v45_v1, %v47_v3 }
  0x10   :  { %v50_v6 = vmul.f32 %v48_v4, %v48_v4  ;;  %v51_v7 = vmul.f32 %v49_v5, %v49_v5 }
  0x12   :  { %v52_v8 = vadd.f32 1e-09, %v50_v6  ;;  %v53_v9 = vadd.f32 1e-09, %v51_v7 }
  0x14   :  { %109 = vrsqrt.f32 %v52_v8  ;;  %vm61_vm0 = vcmp.eq.f32.partialorder %v52_v8, inf  ;;  %v64_v21 = vand.u32 2147483648, %v52_v8  ;;  %vm63_vm1 = vcmp.eq.f32.partialorder %v52_v8, 0.0 }
  0x15   :  { %111 = vrsqrt.f32 %v53_v9  ;;  %vm73_vm2 = vcmp.eq.f32.partialorder %v53_v9, inf  ;;  %v76_v24 = vand.u32 2147483648, %v53_v9  ;;  %vm75_vm3 = vcmp.eq.f32.partialorder %v53_v9, 0.0 }
  0x1a   :  { %v110_v10 = vpop.eup %109 }
  0x1b   :  { %v112_v11 = vpop.eup %111  ;;  %v55_v12 = vmul.f32 %v110_v10, %v52_v8 }
  0x1c   :  { %v67_v13 = vmul.f32 %v112_v11, %v53_v9 }
  0x1d   :  { %v56_v14 = vmul.f32 %v110_v10, %v55_v12 }
  0x1e   :  { %v68_v15 = vmul.f32 %v112_v11, %v67_v13 }
  0x1f   :  { %v57_v16 = vmul.f32 0.5, %v56_v14 }
  0x20   :  { %v69_v17 = vmul.f32 0.5, %v68_v15 }
  0x21   :  { %v58_v18 = vsub.f32 1.5, %v57_v16 }
  0x22   :  { %v70_v19 = vsub.f32 1.5, %v69_v17 }
  0x23   :  { %v59_v20 = vmul.f32 %v110_v10, %v58_v18 }
  0x24   :  { %v71_v22 = vmul.f32 %v112_v11, %v70_v19 }
  0x25   :  { %v60_v23 = vmul.f32 %v59_v20, %v52_v8 }
  0x26   :  { %v72_v25 = vmul.f32 %v71_v22, %v53_v9 }
  0x27   :  { %v62_v26 = vsel %vm61_vm0, %v52_v8, %v60_v23 }
  0x28   :  { %v65_v27 = vsel %vm63_vm1, %v64_v21, %v62_v26  ;;  %v74_v28 = vsel %vm73_vm2, %v53_v9, %v72_v25 }
  0x29   :  { %v77_v29 = vsel %vm75_vm3, %v76_v24, %v74_v28 }
  0x2a   :  { %v78_v30 = vadd.f32 %v77_v29, %v65_v27 }
  0x2c   :  { %v79_v31 = vrot.slane %v78_v30, 4 }
  0x2e   :  { %v80_v32 = vadd.f32 %v79_v31, %v78_v30 }
  0x30   :  { %v81_v33 = vrot.slane %v80_v32, 2 }
  0x32   :  { %v82_v34 = vadd.f32 %v81_v33, %v80_v32 }
  0x34   :  { %v83_v35 = vrot.slane %v82_v34, 1 }
  0x36   :  { %v84_v36 = vadd.f32 %v83_v35, %v82_v34 }
  0x38   :  { %85 = vst [vmem:[#allocation7] sm:$0x1] %v84_v36 }
  0x39   :  { %96 = dma.vmem_to_hbm [thread:$0]  %s92_s1, 16, %s94_s23, [#allocation4]  }
  0x3a   :  { %189 = dma.done.wait [#allocation4], 16  }
  0x3b   :  { %190 = vsyncadd [#allocation4], 4294967280 }
  0x3c   :  { %101 = vsyncpa [#allocation3], 1 }
  0x3d   :  { %102 = vsyncpa [#allocation6], 1 }
  0x3e   :  { %103 = vsyncpa [#allocation4], 1 }

</bundles_post_ra>
